<compile_context>
chip_gen: v7x
topology: tpu7x:2x2x1
jax: 0.10.0
libtpu: 0.0.40
codegen_flags: <defaults>
</compile_context>

<pallas_src>
import jax
import jax.numpy as jnp
from jax.experimental import pallas as pl
from jax.experimental.pallas import tpu as pltpu

EPS = 1e-6


def sublayer_connection_kernel(x_ref, gamma_ref, beta_ref, w_ref, b_ref, o_ref):
    x_in = x_ref[...]                                   # (T, D)
    x = x_in if x_in.dtype == jnp.float32 else x_in.astype(jnp.float32)
    d = x.shape[-1]

    # Hoist parameter reads (JAX does not CSE broadcast_in_dim).
    gamma = gamma_ref[...]                              # (1, D)
    beta = beta_ref[...]                                # (1, D)
    bias = b_ref[...]                                   # (1, D)

    # --- LayerNorm (unbiased std, eps added to std, as in the PyTorch module) ---
    mean = jnp.mean(x, axis=-1, keepdims=True)          # (T, 1)
    diff = x - mean
    var_unbiased = jnp.sum(diff * diff, axis=-1, keepdims=True) / (d - 1)
    std = jnp.sqrt(var_unbiased)                        # (T, 1)
    # Per-row reciprocal on the (T,1) column instead of a (T,D) vector divide.
    inv = pl.reciprocal(std + EPS, approx=False)        # (T, 1)
    normed = (diff * inv) * gamma + beta                # (T, D)

    # --- sublayer: Linear(size, size) on the MXU ---
    y = jnp.dot(normed, w_ref[...], preferred_element_type=jnp.float32)

    # --- dropout (eval mode = identity) + residual add (bias folded in) ---
    out = x + y + bias
    o_ref[...] = out if out.dtype == o_ref.dtype else out.astype(o_ref.dtype)


def sublayer_connection(x, gamma, beta, w, b, *, tile_rows=256):
    """x: (B, S, D). gamma/beta/b: (D,). w: (D, D)."""
    B, S, D = x.shape
    R = B * S

    # Row-tile choice: big (256, MXU-height aligned) by default, clamped to the
    # problem size and kept sublane(8)-aligned; ragged R handled by zero-padding.
    tr = (min(tile_rows, max(R, 8)) // 8) * 8
    R_pad = pl.cdiv(R, tr) * tr

    x2 = x.reshape(R, D)
    if R_pad != R:
        x2 = jnp.pad(x2, ((0, R_pad - R), (0, 0)))
    gamma2 = gamma.reshape(1, D)
    beta2 = beta.reshape(1, D)
    b2 = b.reshape(1, D)

    bytes_per = jnp.dtype(x.dtype).itemsize
    cost = pl.CostEstimate(
        flops=2 * R_pad * D * D + 10 * R_pad * D,
        transcendentals=2 * R_pad,                      # per-row sqrt + reciprocal
        bytes_accessed=2 * R_pad * D * bytes_per + D * D * 4 + 3 * D * 4,
    )

    out = pl.pallas_call(
        sublayer_connection_kernel,
        out_shape=jax.ShapeDtypeStruct((R_pad, D), x.dtype),
        grid_spec=pltpu.PrefetchScalarGridSpec(
            num_scalar_prefetch=0,
            grid=(R_pad // tr,),
            in_specs=[
                pl.BlockSpec((tr, D), lambda i: (i, 0)),   # x rows
                pl.BlockSpec((1, D), lambda i: (0, 0)),    # gamma (grid-invariant)
                pl.BlockSpec((1, D), lambda i: (0, 0)),    # beta  (grid-invariant)
                pl.BlockSpec((D, D), lambda i: (0, 0)),    # linear weight (grid-invariant)
                pl.BlockSpec((1, D), lambda i: (0, 0)),    # linear bias  (grid-invariant)
            ],
            out_specs=pl.BlockSpec((tr, D), lambda i: (i, 0)),
        ),
        compiler_params=pltpu.CompilerParams(
            dimension_semantics=("parallel",),
            vmem_limit_bytes=64 * 1024 * 1024,
        ),
        cost_estimate=cost,
    )(x2, gamma2, beta2, w, b2)

    return out[:R].reshape(B, S, D)


def reference(x, gamma, beta, w, b):
    mean = jnp.mean(x, axis=-1, keepdims=True)
    diff = x - mean
    var = jnp.sum(diff * diff, axis=-1, keepdims=True) / (x.shape[-1] - 1)
    std = jnp.sqrt(var)
    normed = gamma * diff / (std + EPS) + beta
    y = jnp.einsum("bsd,de->bse", normed, w) + b
    return x + y


if __name__ == "__main__":
    key = jax.random.PRNGKey(0)
    B, S, D = 2, 8, 32   # batch=2, seq=8, hidden(size)=32

    kx, kw, kb = jax.random.split(key, 3)
    x = jax.random.normal(kx, (B, S, D), dtype=jnp.float32)

    # LayerNorm params per the module __init__: ones / zeros.
    gamma = jnp.ones((D,), dtype=jnp.float32)
    beta = jnp.zeros((D,), dtype=jnp.float32)

    # Deterministic sublayer (Linear size->size) parameters.
    w = jax.random.normal(kw, (D, D), dtype=jnp.float32) * (1.0 / jnp.sqrt(D))
    b = jax.random.normal(kb, (D,), dtype=jnp.float32) * 0.01

    out = sublayer_connection(x, gamma, beta, w, b)
    out = jax.block_until_ready(out)

    ref = reference(x, gamma, beta, w, b)
    assert jnp.allclose(out, ref, atol=1e-4, rtol=1e-4), "mismatch vs reference"

    print("KERNEL_OK")
</pallas_src>

<mosaic_0001>
module attributes {stable_mosaic.version = 11 : i64} {
  func.func @sublayer_connection_kernel(%arg0: i32, %arg1: memref<16x32xf32, #tpu.memory_space<vmem>>, %arg2: memref<1x32xf32, #tpu.memory_space<vmem>>, %arg3: memref<1x32xf32, #tpu.memory_space<vmem>>, %arg4: memref<32x32xf32, #tpu.memory_space<vmem>>, %arg5: memref<1x32xf32, #tpu.memory_space<vmem>>, %arg6: memref<16x32xf32, #tpu.memory_space<vmem>>) attributes {dimension_semantics = [#tpu.dimension_semantics<parallel>], iteration_bounds = array<i64: 1>, scalar_prefetch = 0 : i64, scratch_operands = 0 : i64, tpu.core_type = #tpu.core_type<tc>, window_params = [{transform_indices = @transform_0, window_bounds = array<i64: 16, 32>}, {pipeline_mode = #tpu.pipeline_mode<synchronous>, transform_indices = @transform_1, window_bounds = array<i64: 1, 32>}, {pipeline_mode = #tpu.pipeline_mode<synchronous>, transform_indices = @transform_2, window_bounds = array<i64: 1, 32>}, {pipeline_mode = #tpu.pipeline_mode<synchronous>, transform_indices = @transform_3, window_bounds = array<i64: 32, 32>}, {pipeline_mode = #tpu.pipeline_mode<synchronous>, transform_indices = @transform_4, window_bounds = array<i64: 1, 32>}, {transform_indices = @transform_5, window_bounds = array<i64: 16, 32>}]} {
    %c0 = arith.constant 0 : index
    %c0_0 = arith.constant 0 : index
    %0 = vector.load %arg1[%c0, %c0_0] : memref<16x32xf32, #tpu.memory_space<vmem>>, vector<16x32xf32>
    %c0_1 = arith.constant 0 : index
    %c0_2 = arith.constant 0 : index
    %1 = vector.load %arg2[%c0_1, %c0_2] : memref<1x32xf32, #tpu.memory_space<vmem>>, vector<1x32xf32>
    %c0_3 = arith.constant 0 : index
    %c0_4 = arith.constant 0 : index
    %2 = vector.load %arg3[%c0_3, %c0_4] : memref<1x32xf32, #tpu.memory_space<vmem>>, vector<1x32xf32>
    %c0_5 = arith.constant 0 : index
    %c0_6 = arith.constant 0 : index
    %3 = vector.load %arg5[%c0_5, %c0_6] : memref<1x32xf32, #tpu.memory_space<vmem>>, vector<1x32xf32>
    %cst = arith.constant dense<0.000000e+00> : vector<16xf32>
    %4 = vector.multi_reduction <add>, %0, %cst [1] : vector<16x32xf32> to vector<16xf32>
    %5 = vector.shape_cast %4 : vector<16xf32> to vector<16x1xf32>
    %cst_7 = arith.constant 3.200000e+01 : f32
    %6 = vector.broadcast %cst_7 : f32 to vector<16x1xf32>
    %7 = arith.divf %5, %6 : vector<16x1xf32>
    %8 = vector.broadcast %7 : vector<16x1xf32> to vector<16x32xf32>
    %9 = arith.subf %0, %8 : vector<16x32xf32>
    %10 = arith.mulf %9, %9 : vector<16x32xf32>
    %cst_8 = arith.constant dense<0.000000e+00> : vector<16xf32>
    %11 = vector.multi_reduction <add>, %10, %cst_8 [1] : vector<16x32xf32> to vector<16xf32>
    %12 = vector.shape_cast %11 : vector<16xf32> to vector<16x1xf32>
    %cst_9 = arith.constant 3.100000e+01 : f32
    %13 = vector.broadcast %cst_9 : f32 to vector<16x1xf32>
    %14 = arith.divf %12, %13 : vector<16x1xf32>
    %15 = math.sqrt %14 : vector<16x1xf32>
    %cst_10 = arith.constant 9.99999997E-7 : f32
    %16 = vector.broadcast %cst_10 : f32 to vector<16x1xf32>
    %17 = arith.addf %15, %16 : vector<16x1xf32>
    %18 = tpu.reciprocal %17 : vector<16x1xf32> -> vector<16x1xf32>
    %19 = vector.broadcast %18 : vector<16x1xf32> to vector<16x32xf32>
    %20 = arith.mulf %9, %19 : vector<16x32xf32>
    %21 = vector.broadcast %1 : vector<1x32xf32> to vector<16x32xf32>
    %22 = arith.mulf %20, %21 : vector<16x32xf32>
    %23 = vector.broadcast %2 : vector<1x32xf32> to vector<16x32xf32>
    %24 = arith.addf %22, %23 : vector<16x32xf32>
    %c0_11 = arith.constant 0 : index
    %c0_12 = arith.constant 0 : index
    %25 = vector.load %arg4[%c0_11, %c0_12] : memref<32x32xf32, #tpu.memory_space<vmem>>, vector<32x32xf32>
    %cst_13 = arith.constant dense<0.000000e+00> : vector<16x32xf32>
    %26 = tpu.matmul %24, %25, %cst_13 {dimension_numbers = #tpu.dot_dimension_numbers<[1], [0], [0], [1], [0, 0, 1, 1], [], []>} : vector<16x32xf32>, vector<32x32xf32>, vector<16x32xf32> -> vector<16x32xf32>
    %27 = arith.addf %0, %26 : vector<16x32xf32>
    %28 = vector.broadcast %3 : vector<1x32xf32> to vector<16x32xf32>
    %29 = arith.addf %27, %28 : vector<16x32xf32>
    %c0_14 = arith.constant 0 : index
    %c0_15 = arith.constant 0 : index
    %30 = vector.load %arg6[%c0_14, %c0_15] : memref<16x32xf32, #tpu.memory_space<vmem>>, vector<16x32xf32>
    tpu.vector_store %arg6[%c0_14, %c0_15], %29 {strides = array<i32>} : memref<16x32xf32, #tpu.memory_space<vmem>>, vector<16x32xf32>,
    return
  }
  func.func @transform_0(%arg0: i32) -> (i32, i32) {
    %c0_i32 = arith.constant 0 : i32
    %c0_i32_0 = arith.constant 0 : i32
    return %arg0, %c0_i32 : i32, i32
  }
  func.func @transform_1(%arg0: i32) -> (i32, i32) {
    %c0_i32 = arith.constant 0 : i32
    %c0_i32_0 = arith.constant 0 : i32
    %c0_i32_1 = arith.constant 0 : i32
    return %c0_i32, %c0_i32_0 : i32, i32
  }
  func.func @transform_2(%arg0: i32) -> (i32, i32) {
    %c0_i32 = arith.constant 0 : i32
    %c0_i32_0 = arith.constant 0 : i32
    %c0_i32_1 = arith.constant 0 : i32
    return %c0_i32, %c0_i32_0 : i32, i32
  }
  func.func @transform_3(%arg0: i32) -> (i32, i32) {
    %c0_i32 = arith.constant 0 : i32
    %c0_i32_0 = arith.constant 0 : i32
    %c0_i32_1 = arith.constant 0 : i32
    return %c0_i32, %c0_i32_0 : i32, i32
  }
  func.func @transform_4(%arg0: i32) -> (i32, i32) {
    %c0_i32 = arith.constant 0 : i32
    %c0_i32_0 = arith.constant 0 : i32
    %c0_i32_1 = arith.constant 0 : i32
    return %c0_i32, %c0_i32_0 : i32, i32
  }
  func.func @transform_5(%arg0: i32) -> (i32, i32) {
    %c0_i32 = arith.constant 0 : i32
    %c0_i32_0 = arith.constant 0 : i32
    return %arg0, %c0_i32 : i32, i32
  }
}

</mosaic_0001>

<bundles_post_ra>
// kernel: tpu_custom_call.1
= control target key start
LH: loop header
LB: loop body
LE: loop exit
PB: predicated region body
PF: predicated region fallthrough
CT: control target
= control target key end

     0   :  { %10 = vsyncpa [#allocation3], 0  ;;  %s586_s0 = inlined_call_operand.hbm [shape: f32[16,32], index: 0, kind: input, shape index: {}]   ;;  %s587_s1 = inlined_call_operand.hbm [shape: f32[1,32], index: 1, kind: input, shape index: {}]   ;;  %s588_s2 = inlined_call_operand.hbm [shape: f32[1,32], index: 2, kind: input, shape index: {}]   ;;  %s589_s3 = inlined_call_operand.hbm [shape: f32[32,32], index: 3, kind: input, shape index: {}]   ;;  %s590_s4 = inlined_call_operand.hbm [shape: f32[1,32], index: 4, kind: input, shape index: {}]   ;;  %s591_s5 = inlined_call_operand.hbm [shape: f32[16,32], index: 5, kind: output, shape index: {}]  }
   0x1   :  { %11 = vsyncpa [#allocation6], 0 }
   0x2   :  { %12 = vsyncpa [#allocation9], 0 }
   0x3   :  { %13 = vsyncpa [#allocation4], 0  ;;  %s449_s18 = smov [#allocation5]   ;;  %s309_s22 = scalar_lea.hbm %s587_s1, 16 }
   0x4   :  { %s32_s19 = sshll.u32 %s449_s18, 4  ;;  %p310_p0 = scmp.ne.s32.totalorder %s587_s1, %s309_s22  ;;  %s33_s19 = int_to_ptr.vmem [resolvable:$true] %s32_s19 }
   0x5   :  { %p313_p1 = scmp.lt.u32.totalorder %s309_s22, %s587_s1 }
   0x7   :  { %p315_p2 = pnand %p313_p1, %p310_p0 }
   0x9   :  { %318 = shalt.err (!%p315_p2)
}
   0xa   :  { %s319_s27 = scalar_lea.vmem %s33_s19, 16  ;;  %s323_s28 = scalar_lea.vmem %s33_s19, 32 }
   0xb   :  { %p320_p3 = scmp.ne.s32.totalorder %s33_s19, %s319_s27  ;;  %p324_p4 = scmp.lt.s32.totalorder %s33_s19, %s33_s19 }
   0xc   :  { %p325_p5 = scmp.lt.s32.totalorder %s323_s28, %s319_s27 }
   0xe   :  { %p326_p6 = por %p325_p5, %p324_p4 }
  0x10   :  { %p327_p7 = pnand %p326_p6, %p320_p3 }
  0x12   :  { %330 = shalt.err (!%p327_p7)
}
  0x13   :  { %35 = dma.hbm_to_vmem [thread:$0]  %s587_s1, 16, %s33_s19, [#allocation6]  }
  0x14   :  { %s450_s6 = smov [#allocation8]   ;;  %s451_s8 = smov [#allocation2]  }
  0x15   :  { %s51_s7 = sshll.u32 %s450_s6, 4  ;;  %s19_s9 = sshll.u32 %s451_s8, 4  ;;  %s52_s7 = int_to_ptr.vmem [resolvable:$true] %s51_s7  ;;  %s20_s9 = int_to_ptr.vmem [resolvable:$true] %s19_s9 }
  0x16   :  { %s331_s12 = scalar_lea.hbm %s589_s3, 512 }
  0x17   :  { %p332_p8 = scmp.ne.s32.totalorder %s589_s3, %s331_s12  ;;  %p335_p9 = scmp.lt.u32.totalorder %s331_s12, %s589_s3 }
  0x19   :  { %p337_p10 = pnand %p335_p9, %p332_p8 }
  0x1b   :  { %340 = shalt.err (!%p337_p10)
}
  0x1c   :  { %s341_s1 = scalar_lea.vmem %s52_s7, 512  ;;  %p346_p12 = scmp.lt.s32.totalorder %s52_s7, %s52_s7 }
  0x1d   :  { %p342_p11 = scmp.ne.s32.totalorder %s52_s7, %s341_s1  ;;  %p347_p13 = scmp.lt.s32.totalorder %s341_s1, %s341_s1 }
  0x1f   :  { %p348_p0 = por %p347_p13, %p346_p12 }
  0x21   :  { %p349_p1 = pnand %p348_p0, %p342_p11 }
  0x23   :  { %352 = shalt.err (!%p349_p1)
}
  0x24   :  { %s452_s17 = smov 128   ;;  %s453_s18 = smov 8  }
  0x25   :  { %57 = dma.hbm_to_vmem [thread:$0]  %s589_s3, 512, %s52_s7, [#allocation9], %s452_s17, %s452_s17, %s453_s18  }
  0x26   :  { %s353_s23 = scalar_lea.hbm %s586_s0, 256 }
  0x27   :  { %p354_p2 = scmp.ne.s32.totalorder %s586_s0, %s353_s23  ;;  %p357_p3 = scmp.lt.u32.totalorder %s353_s23, %s586_s0 }
  0x29   :  { %p359_p4 = pnand %p357_p3, %p354_p2 }
  0x2b   :  { %362 = shalt.err (!%p359_p4)
}
  0x2c   :  { %s363_s28 = scalar_lea.vmem %s20_s9, 256  ;;  %p368_p6 = scmp.lt.s32.totalorder %s20_s9, %s20_s9 }
  0x2d   :  { %p364_p5 = scmp.ne.s32.totalorder %s20_s9, %s363_s28  ;;  %p369_p7 = scmp.lt.s32.totalorder %s363_s28, %s363_s28 }
  0x2f   :  { %p370_p8 = por %p369_p7, %p368_p6 }
  0x31   :  { %p371_p9 = pnand %p370_p8, %p364_p5 }
  0x33   :  { %374 = shalt.err (!%p371_p9)
}
  0x34   :  { %25 = dma.hbm_to_vmem [thread:$0]  %s586_s0, 256, %s20_s9, [#allocation3], %s452_s17, %s452_s17, %s453_s18  }
  0x35   :  { %s454_s30 = smov [#allocation7]   ;;  %s455_s7 = smov [#allocation10]  }
  0x36   :  { %s42_s6 = sshll.u32 %s454_s30, 4  ;;  %s64_s8 = sshll.u32 %s455_s7, 4  ;;  %s43_s6 = int_to_ptr.vmem [resolvable:$true] %s42_s6  ;;  %s65_s8 = int_to_ptr.vmem [resolvable:$true] %s64_s8 }
  0x37   :  { %s375_s12 = scalar_lea.hbm %s588_s2, 16 }
  0x38   :  { %p376_p10 = scmp.ne.s32.totalorder %s588_s2, %s375_s12  ;;  %p379_p11 = scmp.lt.u32.totalorder %s375_s12, %s588_s2 }
  0x3a   :  { %p381_p12 = pnand %p379_p11, %p376_p10 }
  0x3c   :  { %384 = shalt.err (!%p381_p12)
}
  0x3d   :  { %s385_s0 = scalar_lea.vmem %s43_s6, 16  ;;  %s389_s9 = scalar_lea.vmem %s43_s6, 32 }
  0x3e   :  { %p386_p13 = scmp.ne.s32.totalorder %s43_s6, %s385_s0  ;;  %p390_p0 = scmp.lt.s32.totalorder %s43_s6, %s43_s6 }
  0x3f   :  { %p391_p1 = scmp.lt.s32.totalorder %s389_s9, %s385_s0 }
  0x41   :  { %p392_p2 = por %p391_p1, %p390_p0 }
  0x43   :  { %p393_p3 = pnand %p392_p2, %p386_p13 }
  0x45   :  { %396 = shalt.err (!%p393_p3)
}
  0x46   :  { %45 = dma.hbm_to_vmem [thread:$0]  %s588_s2, 16, %s43_s6, [#allocation6]  }
  0x47   :  { %s397_s22 = scalar_lea.hbm %s590_s4, 16 }
  0x48   :  { %p398_p4 = scmp.ne.s32.totalorder %s590_s4, %s397_s22  ;;  %p401_p5 = scmp.lt.u32.totalorder %s397_s22, %s590_s4 }
  0x4a   :  { %p403_p6 = pnand %p401_p5, %p398_p4 }
  0x4c   :  { %406 = shalt.err (!%p403_p6)
}
  0x4d   :  { %s407_s27 = scalar_lea.vmem %s65_s8, 16  ;;  %s411_s28 = scalar_lea.vmem %s65_s8, 32 }
  0x4e   :  { %p408_p7 = scmp.ne.s32.totalorder %s65_s8, %s407_s27  ;;  %p412_p8 = scmp.lt.s32.totalorder %s65_s8, %s65_s8 }
  0x4f   :  { %p413_p9 = scmp.lt.s32.totalorder %s411_s28, %s407_s27 }
  0x51   :  { %p414_p10 = por %p413_p9, %p412_p8 }
  0x53   :  { %p415_p11 = pnand %p414_p10, %p408_p7 }
  0x55   :  { %418 = shalt.err (!%p415_p11)
}
  0x56   :  { %67 = dma.hbm_to_vmem [thread:$0]  %s590_s4, 16, %s65_s8, [#allocation9]  }
  0x57   :  { %441 = dma.done.wait [#allocation3], 256  }
  0x58   :  { %442 = vsyncadd [#allocation3], 4294967040 }
  0x59   :  { %443 = dma.done.wait [#allocation6], 32  }
  0x5a   :  { %444 = vsyncadd [#allocation6], 4294967264 }
  0x5b   :  { %445 = dma.done.wait [#allocation9], 528  }
  0x5c   :  { %446 = vsyncadd [#allocation9], 4294966768  ;;  %vm88_vm0 = vcmask 261120   ;;  %v553_v0 = vld [vmem:[#allocation2] sm:$0xff]  ;;  %v555_v1 = vld [vmem:[#allocation2 + $0x8] sm:$0xff]  ;;  %s456_s4 = smov [#allocation11]  }
  0x5d   :  { %v89_v2 = vsel %vm88_vm0, %v553_v0, 0.0  ;;  %v92_v3 = vsel %vm88_vm0, %v555_v1, 0.0  ;;  %v147_v14 = vld [vmem:[#allocation8] sm:$0xff]  ;;  %v148_v15 = vld [vmem:[#allocation8 + $0x8] sm:$0xff]  ;;  %v149_v16 = vld [vmem:[#allocation8 + $0x10] sm:$0xff]  ;;  %s249_s29 = sshll.u32 %s456_s4, 4  ;;  %s250_s29 = int_to_ptr.vmem [resolvable:$true] %s249_s29 }
  0x5e   :  { %90 = vadd.xlane.f32.xlu0 %v89_v2  ;;  %v285_v17 = vpack.c.bf16 %v148_v15, %v147_v14  ;;  %v150_v18 = vld [vmem:[#allocation8 + $0x18] sm:$0xff]  ;;  %v267_v46 = vld [vmem:[#allocation10] ss:$0 sm:$0xff]  ;;  %s419_s30 = scalar_lea.vmem %s250_s29, 256  ;;  %p424_p13 = scmp.lt.s32.totalorder %s250_s29, %s250_s29 }
  0x5f   :  { %v289_v19 = vpack.c.bf16 %v150_v18, %v149_v16  ;;  %v263_v37 = vld [vmem:[#allocation5] ss:$0 sm:$0xff]  ;;  %v264_v39 = vld [vmem:[#allocation7] ss:$0 sm:$0xff]  ;;  %p420_p12 = scmp.ne.s32.totalorder %s250_s29, %s419_s30  ;;  %p425_p0 = scmp.lt.s32.totalorder %s419_s30, %s419_s30 }
  0x60   :  { %286 = vmatprep.subr.bf16.mxu0 %v285_v17 }
  0x61   :  { %288 = vmatpush3.bf16.msra.mxu0 %v285_v17  ;;  %p426_p1 = por %p425_p0, %p424_p13 }
  0x62   :  { %93 = vadd.xlane.f32.xlu0 %v92_v3  ;;  %290 = vmatprep.subr.bf16.mxu0 %v289_v19 }
  0x63   :  { %p427_p2 = pnand %p426_p1, %p420_p12 }
  0x65   :  { %292 = vmatpush3.bf16.msra.mxu0 %v289_v19 }
  0xeb   :  { %v91_v4 = vpop.xlane.xlu0 %90 }
  0xec   :  { %v96_v5 = vmul.f32 0.03125, %v91_v4 }
  0xee   :  { %v98_v6 = vsub.f32 %v553_v0, %v96_v5 }
  0xef   :  { %v94_v7 = vpop.xlane.xlu0 %93 }
  0xf0   :  { %v97_v8 = vmul.f32 0.03125, %v94_v7  ;;  %v100_v9 = vmul.f32 %v98_v6, %v98_v6 }
  0xf2   :  { %v99_v10 = vsub.f32 %v555_v1, %v97_v8  ;;  %v102_v11 = vsel %vm88_vm0, %v100_v9, 0.0 }
  0xf3   :  { %103 = vadd.xlane.f32.xlu1 %v102_v11 }
  0xf4   :  { %v101_v12 = vmul.f32 %v99_v10, %v99_v10 }
  0xf6   :  { %v105_v13 = vsel %vm88_vm0, %v101_v12, 0.0 }
  0xf7   :  { %106 = vadd.xlane.f32.xlu1 %v105_v13 }
 0x180   :  { %v104_v20 = vpop.xlane.xlu1 %103 }
 0x181   :  { %v109_v21 = vmul.f32 0.032258064, %v104_v20 }
 0x183   :  { %301 = vrsqrt.f32 %v109_v21  ;;  %vm113_vm1 = vcmp.eq.f32.partialorder %v109_v21, inf  ;;  %v116_v26 = vand.u32 2147483648, %v109_v21  ;;  %vm115_vm2 = vcmp.eq.f32.partialorder %v109_v21, 0.0 }
 0x184   :  { %v107_v22 = vpop.xlane.xlu1 %106 }
 0x185   :  { %v110_v23 = vmul.f32 0.032258064, %v107_v22 }
 0x187   :  { %303 = vrsqrt.f32 %v110_v23  ;;  %vm120_vm3 = vcmp.eq.f32.partialorder %v110_v23, inf  ;;  %v123_v32 = vand.u32 2147483648, %v110_v23  ;;  %vm122_vm4 = vcmp.eq.f32.partialorder %v110_v23, 0.0 }
 0x18d   :  { %v302_v24 = vpop.eup %301 }
 0x18e   :  { %v112_v25 = vmul.f32 %v302_v24, %v109_v21 }
 0x190   :  { %v114_v27 = vsel %vm113_vm1, %v109_v21, %v112_v25 }
 0x191   :  { %v304_v28 = vpop.eup %303  ;;  %v117_v29 = vsel %vm115_vm2, %v116_v26, %v114_v27 }
 0x192   :  { %v119_v30 = vmul.f32 %v304_v28, %v110_v23  ;;  %v125_v31 = vadd.f32 1e-06, %v117_v29 }
 0x194   :  { %v121_v33 = vsel %vm120_vm3, %v110_v23, %v119_v30  ;;  %305 = vrcp.f32 %v125_v31 }
 0x195   :  { %v124_v34 = vsel %vm122_vm4, %v123_v32, %v121_v33 }
 0x196   :  { %v126_v35 = vadd.f32 1e-06, %v124_v34 }
 0x198   :  { %307 = vrcp.f32 %v126_v35 }
 0x19e   :  { %v306_v36 = vpop.eup %305 }
 0x19f   :  { %v129_v38 = vmul.f32 %v306_v36, %v98_v6 }
 0x1a1   :  { %v137_v40 = vmul.f32 %v263_v37, %v129_v38 }
 0x1a2   :  { %v308_v41 = vpop.eup %307 }
 0x1a3   :  { %v130_v42 = vmul.f32 %v308_v41, %v99_v10  ;;  %v145_v43 = vadd.f32 %v264_v39, %v137_v40 }
 0x1a5   :  { %v138_v44 = vmul.f32 %v263_v37, %v130_v42  ;;  %282 = vmatprep.mubr.msk.f32.mxu0 %vm88_vm0, %v145_v43 }
 0x1a7   :  { %v146_v45 = vadd.f32 %v264_v39, %v138_v44 }
 0x1a9   :  { %283 = vmatmul.mubr.msk.f32.vlgmr.msra.gmra.mrb[0].mxu0 %vm88_vm0, %v146_v45 }
 0x27c   :  { %v284_v47 = vpop.f32.mrb[0].mxu0 }
 0x27d   :  { %v233_v48 = vadd.f32 %v284_v47, %v555_v1  ;;  %v223_v49 = vpop.f32.mrb[1].mxu0 }
 0x27e   :  { %v232_v50 = vadd.f32 %v223_v49, %v553_v0 }
 0x27f   :  { %v241_v51 = vadd.f32 %v267_v46, %v233_v48 }
 0x280   :  { %v240_v52 = vadd.f32 %v267_v46, %v232_v50 }
 0x281   :  { %243 = vst.msk [vmem:[#allocation11 + $0x8] sm:$0xff] %vm88_vm0, %v241_v51 }
 0x282   :  { %242 = vst.msk [vmem:[#allocation11] sm:$0xff] %vm88_vm0, %v240_v52 }
 0x283   :  { %430 = shalt.err (!%p427_p2)
}
 0x284   :  { %s431_s8 = scalar_lea.hbm %s591_s5, 256 }
 0x285   :  { %p432_p3 = scmp.ne.s32.totalorder %s591_s5, %s431_s8  ;;  %p435_p4 = scmp.lt.u32.totalorder %s431_s8, %s591_s5 }
 0x287   :  { %p437_p5 = pnand %p435_p4, %p432_p3 }
 0x289   :  { %440 = shalt.err (!%p437_p5)
}
 0x28a   :  { %255 = dma.vmem_to_hbm [thread:$0]  %s250_s29, 256, %s591_s5, [#allocation4], %s452_s17, %s452_s17, %s453_s18  }
 0x28b   :  { %447 = dma.done.wait [#allocation4], 256  }
 0x28c   :  { %448 = vsyncadd [#allocation4], 4294967040 }
 0x28d   :  { %259 = vsyncpa [#allocation3], 1 }
 0x28e   :  { %260 = vsyncpa [#allocation6], 1 }
 0x28f   :  { %261 = vsyncpa [#allocation9], 1 }
 0x290   :  { %262 = vsyncpa [#allocation4], 1 }

</bundles_post_ra>
